<compile_context>
chip_gen: v7x
topology: tpu7x:2x2x1
jax: 0.10.0
libtpu: 0.0.40
codegen_flags: <defaults>
</compile_context>

<pallas_src>
import jax
import jax.numpy as jnp
from jax import lax
from jax.experimental import pallas as pl
from jax.experimental.pallas import tpu as pltpu

_LANE = 128
_SUBLANE = 8
# 2048 rows * 128 lanes * 4 B = 1 MiB per f32 block; x2 double-buffer = 2 MiB.
_MAX_BLOCK_ROWS = 2048


def _make_kernel(block_rows, total_rows, eps, needs_mask):
    eps_f = float(eps)  # Python float -> lowers to a literal, not a captured const.

    def kernel(x_ref, o_ref):
        # Cast in-kernel (free in the VALU slot); DMA stays in the native dtype.
        xv = x_ref[...].astype(jnp.float32)               # (block_rows, 128)
        contrib = xv * jnp.log(xv + eps_f)                # VPU mul + EUP log

        if needs_mask:
            # Only the ragged last grid block actually needs this; static flag
            # keeps the select out of the hot path when the grid divides evenly.
            i = pl.program_id(0)
            row_idx = lax.broadcasted_iota(jnp.int32, (block_rows, _LANE), 0)
            contrib = jnp.where(i * block_rows + row_idx < total_rows,
                                contrib, 0.0)

        # Pure-VPU fold of the block into one (8,128) vreg: reshape keeps each
        # (8,128) tile intact, sum over the leading axis is vreg-wise adds.
        partial = contrib.reshape(block_rows // _SUBLANE, _SUBLANE, _LANE).sum(axis=0)
        o_ref[...] = partial[None, :, :]                  # lane-dense partial output

    return kernel


def entropy_loss(x, eps=1e-12):
    """Pallas equivalent of EntropyLoss.forward for any array with channel dim=1."""
    c = x.shape[1]
    numel = x.size
    n_reduced = numel // c  # elements remaining after the dim=1 sum (mean divisor)

    flat = x.reshape(-1)  # pure reshape: no HBM copy, keep native dtype
    tile_elems = _SUBLANE * _LANE
    padded = pl.cdiv(numel, tile_elems) * tile_elems
    if padded != numel:
        # Rare ragged case only: zero pad (0 * log(0 + eps) == 0, sum unchanged).
        flat = jnp.pad(flat, (0, padded - numel))
    x2d = flat.reshape(-1, _LANE)  # (R, 128), R a multiple of 8
    total_rows = x2d.shape[0]

    block_rows = min(_MAX_BLOCK_ROWS, total_rows)
    n_blocks = pl.cdiv(total_rows, block_rows)
    needs_mask = (total_rows % block_rows) != 0

    kernel = _make_kernel(block_rows, total_rows, eps, needs_mask)

    cost = pl.CostEstimate(
        flops=2 * numel,
        transcendentals=numel,
        bytes_accessed=x2d.size * x2d.dtype.itemsize
        + n_blocks * _SUBLANE * _LANE * 4,
    )

    partials = pl.pallas_call(
        kernel,
        out_shape=jax.ShapeDtypeStruct((n_blocks, _SUBLANE, _LANE), jnp.float32),
        grid_spec=pltpu.PrefetchScalarGridSpec(
            num_scalar_prefetch=0,
            grid=(n_blocks,),
            in_specs=[pl.BlockSpec((block_rows, _LANE), lambda i: (i, 0))],
            out_specs=pl.BlockSpec((1, _SUBLANE, _LANE), lambda i: (i, 0, 0)),
        ),
        compiler_params=pltpu.CompilerParams(
            dimension_semantics=("parallel",),
        ),
        cost_estimate=cost,
    )(x2d)

    # Tiny cross-lane / cross-block combine (pairwise in XLA) + normalization.
    total = jnp.sum(partials)
    return -total / jnp.float32(n_reduced)


def _reference(x, eps=1e-12):
    b = x * jnp.log(x + eps)
    b = -1.0 * b.sum(axis=1)
    return b.mean()


if __name__ == "__main__":
    key = jax.random.PRNGKey(0)
    # Small NCHW input; softmax over dim=1 so it looks like a probability map.
    logits = jax.random.normal(key, (2, 4, 16, 16), dtype=jnp.float32)
    x = jax.nn.softmax(logits, axis=1)

    out = jax.block_until_ready(entropy_loss(x))
    ref = _reference(x)
    assert jnp.allclose(out, ref, rtol=1e-5, atol=1e-6), (out, ref)
    print("KERNEL_OK")
</pallas_src>

<mosaic_0001>
module attributes {stable_mosaic.version = 11 : i64} {
  func.func @kernel(%arg0: i32, %arg1: memref<16x128xf32, #tpu.memory_space<vmem>>, %arg2: memref<1x8x128xf32, #tpu.memory_space<vmem>>) attributes {dimension_semantics = [#tpu.dimension_semantics<parallel>], iteration_bounds = array<i64: 1>, scalar_prefetch = 0 : i64, scratch_operands = 0 : i64, tpu.core_type = #tpu.core_type<tc>, window_params = [{transform_indices = @transform_0, window_bounds = array<i64: 16, 128>}, {transform_indices = @transform_1, window_bounds = array<i64: 1, 8, 128>}]} {
    %c0 = arith.constant 0 : index
    %c0_0 = arith.constant 0 : index
    %0 = vector.load %arg1[%c0, %c0_0] : memref<16x128xf32, #tpu.memory_space<vmem>>, vector<16x128xf32>
    %cst = arith.constant 9.99999996E-13 : f32
    %1 = vector.broadcast %cst : f32 to vector<16x128xf32>
    %2 = arith.addf %0, %1 : vector<16x128xf32>
    %3 = math.log %2 : vector<16x128xf32>
    %4 = arith.mulf %0, %3 : vector<16x128xf32>
    %5 = vector.shape_cast %4 : vector<16x128xf32> to vector<2x8x128xf32>
    %cst_1 = arith.constant dense<0.000000e+00> : vector<8x128xf32>
    %6 = vector.multi_reduction <add>, %5, %cst_1 [0] : vector<2x8x128xf32> to vector<8x128xf32>
    %7 = vector.shape_cast %6 : vector<8x128xf32> to vector<1x8x128xf32>
    %c0_2 = arith.constant 0 : index
    %c0_3 = arith.constant 0 : index
    %c0_4 = arith.constant 0 : index
    %8 = vector.load %arg2[%c0_2, %c0_3, %c0_4] : memref<1x8x128xf32, #tpu.memory_space<vmem>>, vector<1x8x128xf32>
    tpu.vector_store %arg2[%c0_2, %c0_3, %c0_4], %7 {strides = array<i32>} : memref<1x8x128xf32, #tpu.memory_space<vmem>>, vector<1x8x128xf32>,
    return
  }
  func.func @transform_0(%arg0: i32) -> (i32, i32) {
    %c0_i32 = arith.constant 0 : i32
    %c0_i32_0 = arith.constant 0 : i32
    return %arg0, %c0_i32 : i32, i32
  }
  func.func @transform_1(%arg0: i32) -> (i32, i32, i32) {
    %c0_i32 = arith.constant 0 : i32
    %c0_i32_0 = arith.constant 0 : i32
    %c0_i32_1 = arith.constant 0 : i32
    return %arg0, %c0_i32, %c0_i32_0 : i32, i32, i32
  }
}

</mosaic_0001>

<bundles_post_ra>
// kernel: tpu_custom_call.1
= control target key start
LH: loop header
LB: loop body
LE: loop exit
PB: predicated region body
PF: predicated region fallthrough
CT: control target
= control target key end

     0   :  { %6 = vsyncpa [#allocation3], 0  ;;  %s144_s0 = inlined_call_operand.hbm [shape: f32[16,128], index: 0, kind: input, shape index: {}]   ;;  %s145_s1 = inlined_call_operand.hbm [shape: f32[1,8,128], index: 1, kind: output, shape index: {}]  }
   0x1   :  { %7 = vsyncpa [#allocation4], 0  ;;  %s106_s6 = smov [#allocation2]   ;;  %s58_s10 = scalar_lea.hbm %s144_s0, 256 }
   0x2   :  { %s13_s7 = sshll.u32 %s106_s6, 4  ;;  %p59_p0 = scmp.ne.s32.totalorder %s144_s0, %s58_s10  ;;  %s14_s7 = int_to_ptr.vmem [resolvable:$true] %s13_s7 }
   0x3   :  { %p62_p1 = scmp.lt.u32.totalorder %s58_s10, %s144_s0 }
   0x5   :  { %p64_p2 = pnand %p62_p1, %p59_p0 }
   0x7   :  { %67 = shalt.err (!%p64_p2)
}
   0x8   :  { %s68_s15 = scalar_lea.vmem %s14_s7, 256  ;;  %p73_p4 = scmp.lt.s32.totalorder %s14_s7, %s14_s7 }
   0x9   :  { %p69_p3 = scmp.ne.s32.totalorder %s14_s7, %s68_s15  ;;  %p74_p5 = scmp.lt.s32.totalorder %s68_s15, %s68_s15 }
   0xb   :  { %p75_p6 = por %p74_p5, %p73_p4 }
   0xd   :  { %p76_p7 = pnand %p75_p6, %p69_p3 }
   0xf   :  { %79 = shalt.err (!%p76_p7)
}
  0x10   :  { %s107_s16 = smov 128   ;;  %s108_s17 = smov 8  }
  0x11   :  { %19 = dma.hbm_to_vmem [thread:$0]  %s144_s0, 256, %s14_s7, [#allocation3], %s107_s16, %s107_s16, %s108_s17  }
  0x12   :  { %102 = dma.done.wait [#allocation3], 256  }
  0x13   :  { %103 = vsyncadd [#allocation3], 4294967040  ;;  %v23_v0 = vld [vmem:[#allocation2] sm:$0xff]  ;;  %v24_v1 = vld [vmem:[#allocation2 + $0x8] sm:$0xff]  ;;  %s109_s20 = smov [#allocation5]  }
  0x14   :  { %v25_v2 = vadd.f32 1e-12, %v23_v0  ;;  %v26_v3 = vadd.f32 1e-12, %v24_v1  ;;  %s41_s21 = sshll.u32 %s109_s20, 4  ;;  %s42_s21 = int_to_ptr.vmem [resolvable:$true] %s41_s21 }
  0x15   :  { %s80_s0 = scalar_lea.vmem %s42_s21, 128  ;;  %p85_p9 = scmp.lt.s32.totalorder %s42_s21, %s42_s21 }
  0x16   :  { %54 = vlog2.f32 %v25_v2  ;;  %p81_p8 = scmp.ne.s32.totalorder %s42_s21, %s80_s0  ;;  %p86_p10 = scmp.lt.s32.totalorder %s80_s0, %s80_s0 }
  0x17   :  { %56 = vlog2.f32 %v26_v3 }
  0x18   :  { %p87_p11 = por %p86_p10, %p85_p9 }
  0x1a   :  { %p88_p12 = pnand %p87_p11, %p81_p8 }
  0x20   :  { %v55_v4 = vpop.eup %54 }
  0x21   :  { %v57_v5 = vpop.eup %56  ;;  %v28_v6 = vmul.f32 0.6931472, %v55_v4 }
  0x22   :  { %v30_v7 = vmul.f32 0.6931472, %v57_v5 }
  0x23   :  { %v31_v8 = vmul.f32 %v28_v6, %v23_v0 }
  0x24   :  { %v32_v9 = vmul.f32 %v30_v7, %v24_v1 }
  0x26   :  { %v33_v10 = vadd.f32 %v32_v9, %v31_v8 }
  0x28   :  { %34 = vst [vmem:[#allocation5] sm:$0xff] %v33_v10 }
  0x29   :  { %91 = shalt.err (!%p88_p12)
}
  0x2a   :  { %s92_s24 = scalar_lea.hbm %s145_s1, 128 }
  0x2b   :  { %p93_p13 = scmp.ne.s32.totalorder %s145_s1, %s92_s24  ;;  %p96_p0 = scmp.lt.u32.totalorder %s92_s24, %s145_s1 }
  0x2d   :  { %p98_p1 = pnand %p96_p0, %p93_p13 }
  0x2f   :  { %101 = shalt.err (!%p98_p1)
}
  0x30   :  { %44 = dma.vmem_to_hbm [thread:$0]  %s42_s21, 128, %s145_s1, [#allocation4]  }
  0x31   :  { %104 = dma.done.wait [#allocation4], 128  }
  0x32   :  { %105 = vsyncadd [#allocation4], 4294967168 }
  0x33   :  { %48 = vsyncpa [#allocation3], 1 }
  0x34   :  { %49 = vsyncpa [#allocation4], 1 }

</bundles_post_ra>
